<compile_context>
chip_gen: v7x
topology: tpu7x:2x2x1
jax: 0.10.0
libtpu: 0.0.40
codegen_flags: <defaults>
</compile_context>

<pallas_src>
import functools

import jax
import jax.numpy as jnp
from jax.experimental import pallas as pl
from jax.experimental.pallas import tpu as pltpu

_LANE = 128


def _round_up(x, m):
    return ((x + m - 1) // m) * m


def _softmax_store(logits, o_ref):
    m = jnp.max(logits, axis=-1, keepdims=True)
    e = jnp.exp(logits - m)
    # Exact divide (the approx EUP reciprocal is not accurate enough for
    # sum-to-one at 1e-3 tolerance and the divide is nowhere near the
    # bottleneck here).
    o_ref[...] = (e / jnp.sum(e, axis=-1, keepdims=True)).astype(o_ref.dtype)


def _mlp_kernel_eval(x_ref, w1_ref, b1_ref, w2_ref, b2_ref, o_ref, *,
                     matmul_dtype):
    """Eval mode: fc1 -> ReLU -> (dropout = identity) -> fc2 -> softmax."""
    x = x_ref[...].astype(matmul_dtype)
    h = jnp.dot(x, w1_ref[...].astype(matmul_dtype),
                preferred_element_type=jnp.float32)
    h = jnp.maximum(h + b1_ref[...], 0.0)

    logits = jnp.dot(h.astype(matmul_dtype), w2_ref[...].astype(matmul_dtype),
                     preferred_element_type=jnp.float32) + b2_ref[...]
    _softmax_store(logits, o_ref)


def _mlp_kernel_train(x_ref, w1_ref, b1_ref, w2_ref, b2_ref, bits_ref, o_ref,
                      *, keep_threshold, keep_scale, matmul_dtype):
    """Training mode with inverted dropout.

    The Bernoulli mask comes from uint32 random bits streamed in per batch
    tile; keep iff bits >= keep_threshold, i.e. P(keep) = 1 - dropout_prob,
    kept activations scaled by 1/(1 - dropout_prob) (same semantics as
    torch.nn.Dropout; the RNG stream will not bitwise-match torch's).
    """
    x = x_ref[...].astype(matmul_dtype)
    h = jnp.dot(x, w1_ref[...].astype(matmul_dtype),
                preferred_element_type=jnp.float32)
    h = jnp.maximum(h + b1_ref[...], 0.0)

    keep = bits_ref[...] >= jnp.uint32(keep_threshold)
    h = jnp.where(keep, h * jnp.float32(keep_scale), 0.0)

    logits = jnp.dot(h.astype(matmul_dtype), w2_ref[...].astype(matmul_dtype),
                     preferred_element_type=jnp.float32) + b2_ref[...]
    _softmax_store(logits, o_ref)


def two_layer_nn_forward(x, w1, b1, w2, b2, *, dropout_prob=0.0,
                         training=False, rng_key=None, block_b=512,
                         matmul_dtype=jnp.float32):
    """Fused TwoLayerNN forward.

    x:  (B, input_size) f32
    w1: (input_size, hidden)   (transposed vs torch's (hidden, input_size))
    b1: (hidden,)
    w2: (hidden, output)
    b2: (output,)
    Returns (B, output) f32 softmax probabilities.
    """
    B, in_size = x.shape
    hidden = w1.shape[1]
    out_size = w2.shape[1]

    use_dropout = training and dropout_prob > 0.0
    if use_dropout and not (0.0 < dropout_prob < 1.0):
        raise ValueError("dropout_prob must be in [0, 1) for training mode")

    # --- lane-dense padding of feature dims (zeros; -1e30 bias on padded
    # output columns so exp() underflows to 0 and the softmax ignores them).
    h_pad = _round_up(hidden, _LANE)
    o_pad = _round_up(out_size, _LANE)
    f32 = jnp.float32
    w1p = jnp.zeros((in_size, h_pad), f32).at[:, :hidden].set(w1.astype(f32))
    b1p = jnp.zeros((1, h_pad), f32).at[:, :hidden].set(b1.astype(f32))
    w2p = jnp.zeros((h_pad, o_pad), f32).at[:hidden, :out_size].set(w2.astype(f32))
    b2p = jnp.full((1, o_pad), -1e30, f32).at[:, :out_size].set(b2.astype(f32))

    # --- batch tiling (pad B up to a multiple of the tile; slice back later).
    tb = min(block_b, _round_up(B, 8))
    b_padded = _round_up(B, tb)
    xp = x if b_padded == B else jnp.zeros((b_padded, in_size), x.dtype).at[:B].set(x)

    grid = (pl.cdiv(b_padded, tb),)
    out_shape = jax.ShapeDtypeStruct((b_padded, o_pad), jnp.float32)
    cparams = pltpu.CompilerParams(dimension_semantics=("parallel",))

    x_spec = pl.BlockSpec((tb, in_size), lambda i: (i, 0))
    w1_spec = pl.BlockSpec((in_size, h_pad), lambda i: (0, 0))
    b1_spec = pl.BlockSpec((1, h_pad), lambda i: (0, 0))
    w2_spec = pl.BlockSpec((h_pad, o_pad), lambda i: (0, 0))
    b2_spec = pl.BlockSpec((1, o_pad), lambda i: (0, 0))
    out_spec = pl.BlockSpec((tb, o_pad), lambda i: (i, 0))

    # TODO(synk): for non-toy layer sizes (e.g. 4k x 4k weights) add a K-tiling
    # grid axis + f32 VMEM accumulator and re-derive tiles against v7x's
    # 64 MiB VMEM; unnecessary at these shapes.

    if use_dropout:
        if rng_key is None:
            rng_key = jax.random.PRNGKey(0)
        keep_threshold = min(int(float(dropout_prob) * 4294967296.0), 4294967295)
        keep_scale = 1.0 / (1.0 - float(dropout_prob))
        bits = jax.random.bits(rng_key, (b_padded, h_pad), jnp.uint32)
        kernel = functools.partial(_mlp_kernel_train,
                                   keep_threshold=keep_threshold,
                                   keep_scale=keep_scale,
                                   matmul_dtype=matmul_dtype)
        grid_spec = pltpu.PrefetchScalarGridSpec(
            num_scalar_prefetch=0,
            grid=grid,
            in_specs=[x_spec, w1_spec, b1_spec, w2_spec, b2_spec,
                      pl.BlockSpec((tb, h_pad), lambda i: (i, 0))],
            out_specs=out_spec,
        )
        out = pl.pallas_call(kernel, out_shape=out_shape, grid_spec=grid_spec,
                             compiler_params=cparams)(
            xp, w1p, b1p, w2p, b2p, bits)
    else:
        kernel = functools.partial(_mlp_kernel_eval, matmul_dtype=matmul_dtype)
        grid_spec = pltpu.PrefetchScalarGridSpec(
            num_scalar_prefetch=0,
            grid=grid,
            in_specs=[x_spec, w1_spec, b1_spec, w2_spec, b2_spec],
            out_specs=out_spec,
        )
        out = pl.pallas_call(kernel, out_shape=out_shape, grid_spec=grid_spec,
                             compiler_params=cparams)(xp, w1p, b1p, w2p, b2p)

    return out[:B, :out_size]


def init_params(key, input_size, hidden_size, output_size):
    """torch.nn.Linear default init: U(-1/sqrt(fan_in), 1/sqrt(fan_in)) for
    weight and bias. Weights returned already transposed to (in, out)."""
    k1, k2, k3, k4 = jax.random.split(key, 4)
    bound1 = 1.0 / (input_size ** 0.5)
    bound2 = 1.0 / (hidden_size ** 0.5)
    w1 = jax.random.uniform(k1, (input_size, hidden_size), jnp.float32,
                            -bound1, bound1)
    b1 = jax.random.uniform(k2, (hidden_size,), jnp.float32, -bound1, bound1)
    w2 = jax.random.uniform(k3, (hidden_size, output_size), jnp.float32,
                            -bound2, bound2)
    b2 = jax.random.uniform(k4, (output_size,), jnp.float32, -bound2, bound2)
    return w1, b1, w2, b2


if __name__ == "__main__":
    # Small shapes consistent with the module: batch=8, input=16, hidden=32, out=8.
    input_size, hidden_size, output_size = 16, 32, 8
    batch = 8
    dropout_prob = 0.5

    key = jax.random.PRNGKey(0)
    kx, kp, kd = jax.random.split(key, 3)
    x = jax.random.normal(kx, (batch, input_size), jnp.float32)
    w1, b1, w2, b2 = init_params(kp, input_size, hidden_size, output_size)

    # Eval-mode forward (dropout is identity, as in module.eval()).
    # On v6e/v7x pass matmul_dtype=jnp.bfloat16 for MXU throughput at scale.
    out = two_layer_nn_forward(x, w1, b1, w2, b2,
                               dropout_prob=dropout_prob, training=False)
    out = jax.block_until_ready(out)

    # Cross-check against a plain-JAX reference.
    ref = jax.nn.softmax(jnp.maximum(x @ w1 + b1, 0.0) @ w2 + b2, axis=-1)
    assert out.shape == (batch, output_size)
    assert jnp.allclose(out, ref, atol=1e-4, rtol=1e-4), "mismatch vs reference"
    assert jnp.allclose(jnp.sum(out, axis=-1), 1.0, atol=1e-4)

    # Training-mode forward to exercise the fused dropout path.
    # TODO(synk): the dropout mask uses JAX's RNG, so it will not bitwise-match
    # torch's RNG stream (same Bernoulli / 1/(1-p) scaling semantics).
    out_tr = two_layer_nn_forward(x, w1, b1, w2, b2,
                                  dropout_prob=dropout_prob, training=True,
                                  rng_key=kd)
    out_tr = jax.block_until_ready(out_tr)
    assert out_tr.shape == (batch, output_size)
    assert bool(jnp.all(jnp.isfinite(out_tr)))
    assert jnp.allclose(jnp.sum(out_tr, axis=-1), 1.0, atol=1e-4)

    print("KERNEL_OK")
</pallas_src>

<mosaic_0001>
module attributes {stable_mosaic.version = 11 : i64} {
  func.func @_mlp_kernel_eval(%arg0: i32, %arg1: memref<8x16xf32, #tpu.memory_space<vmem>>, %arg2: memref<16x128xf32, #tpu.memory_space<vmem>>, %arg3: memref<1x128xf32, #tpu.memory_space<vmem>>, %arg4: memref<128x128xf32, #tpu.memory_space<vmem>>, %arg5: memref<1x128xf32, #tpu.memory_space<vmem>>, %arg6: memref<8x128xf32, #tpu.memory_space<vmem>>) attributes {dimension_semantics = [#tpu.dimension_semantics<parallel>], iteration_bounds = array<i64: 1>, scalar_prefetch = 0 : i64, scratch_operands = 0 : i64, tpu.core_type = #tpu.core_type<tc>, window_params = [{transform_indices = @transform_0, window_bounds = array<i64: 8, 16>}, {pipeline_mode = #tpu.pipeline_mode<synchronous>, transform_indices = @transform_1, window_bounds = array<i64: 16, 128>}, {pipeline_mode = #tpu.pipeline_mode<synchronous>, transform_indices = @transform_2, window_bounds = array<i64: 1, 128>}, {pipeline_mode = #tpu.pipeline_mode<synchronous>, transform_indices = @transform_3, window_bounds = array<i64: 128, 128>}, {pipeline_mode = #tpu.pipeline_mode<synchronous>, transform_indices = @transform_4, window_bounds = array<i64: 1, 128>}, {transform_indices = @transform_5, window_bounds = array<i64: 8, 128>}]} {
    %c0 = arith.constant 0 : index
    %c0_0 = arith.constant 0 : index
    %0 = vector.load %arg1[%c0, %c0_0] : memref<8x16xf32, #tpu.memory_space<vmem>>, vector<8x16xf32>
    %c0_1 = arith.constant 0 : index
    %c0_2 = arith.constant 0 : index
    %1 = vector.load %arg2[%c0_1, %c0_2] : memref<16x128xf32, #tpu.memory_space<vmem>>, vector<16x128xf32>
    %cst = arith.constant dense<0.000000e+00> : vector<8x128xf32>
    %2 = tpu.matmul %0, %1, %cst {dimension_numbers = #tpu.dot_dimension_numbers<[1], [0], [0], [1], [0, 0, 1, 1], [], []>} : vector<8x16xf32>, vector<16x128xf32>, vector<8x128xf32> -> vector<8x128xf32>
    %c0_3 = arith.constant 0 : index
    %c0_4 = arith.constant 0 : index
    %3 = vector.load %arg3[%c0_3, %c0_4] : memref<1x128xf32, #tpu.memory_space<vmem>>, vector<1x128xf32>
    %4 = vector.broadcast %3 : vector<1x128xf32> to vector<8x128xf32>
    %5 = arith.addf %2, %4 : vector<8x128xf32>
    %cst_5 = arith.constant 0.000000e+00 : f32
    %6 = vector.broadcast %cst_5 : f32 to vector<8x128xf32>
    %7 = arith.maximumf %5, %6 : vector<8x128xf32>
    %c0_6 = arith.constant 0 : index
    %c0_7 = arith.constant 0 : index
    %8 = vector.load %arg4[%c0_6, %c0_7] : memref<128x128xf32, #tpu.memory_space<vmem>>, vector<128x128xf32>
    %cst_8 = arith.constant dense<0.000000e+00> : vector<8x128xf32>
    %9 = tpu.matmul %7, %8, %cst_8 {dimension_numbers = #tpu.dot_dimension_numbers<[1], [0], [0], [1], [0, 0, 1, 1], [], []>} : vector<8x128xf32>, vector<128x128xf32>, vector<8x128xf32> -> vector<8x128xf32>
    %c0_9 = arith.constant 0 : index
    %c0_10 = arith.constant 0 : index
    %10 = vector.load %arg5[%c0_9, %c0_10] : memref<1x128xf32, #tpu.memory_space<vmem>>, vector<1x128xf32>
    %11 = vector.broadcast %10 : vector<1x128xf32> to vector<8x128xf32>
    %12 = arith.addf %9, %11 : vector<8x128xf32>
    %cst_11 = arith.constant dense<0xFF800000> : vector<8xf32>
    %13 = vector.multi_reduction <maximumf>, %12, %cst_11 [1] : vector<8x128xf32> to vector<8xf32>
    %14 = vector.shape_cast %13 : vector<8xf32> to vector<8x1xf32>
    %15 = vector.broadcast %14 : vector<8x1xf32> to vector<8x128xf32>
    %16 = arith.subf %12, %15 : vector<8x128xf32>
    %17 = math.exp %16 : vector<8x128xf32>
    %cst_12 = arith.constant dense<0.000000e+00> : vector<8xf32>
    %18 = vector.multi_reduction <add>, %17, %cst_12 [1] : vector<8x128xf32> to vector<8xf32>
    %19 = vector.shape_cast %18 : vector<8xf32> to vector<8x1xf32>
    %20 = vector.broadcast %19 : vector<8x1xf32> to vector<8x128xf32>
    %21 = arith.divf %17, %20 : vector<8x128xf32>
    %c0_13 = arith.constant 0 : index
    %c0_14 = arith.constant 0 : index
    %22 = vector.load %arg6[%c0_13, %c0_14] : memref<8x128xf32, #tpu.memory_space<vmem>>, vector<8x128xf32>
    tpu.vector_store %arg6[%c0_13, %c0_14], %21 {strides = array<i32>} : memref<8x128xf32, #tpu.memory_space<vmem>>, vector<8x128xf32>,
    return
  }
  func.func @transform_0(%arg0: i32) -> (i32, i32) {
    %c0_i32 = arith.constant 0 : i32
    %c0_i32_0 = arith.constant 0 : i32
    return %arg0, %c0_i32 : i32, i32
  }
  func.func @transform_1(%arg0: i32) -> (i32, i32) {
    %c0_i32 = arith.constant 0 : i32
    %c0_i32_0 = arith.constant 0 : i32
    %c0_i32_1 = arith.constant 0 : i32
    return %c0_i32, %c0_i32_0 : i32, i32
  }
  func.func @transform_2(%arg0: i32) -> (i32, i32) {
    %c0_i32 = arith.constant 0 : i32
    %c0_i32_0 = arith.constant 0 : i32
    %c0_i32_1 = arith.constant 0 : i32
    return %c0_i32, %c0_i32_0 : i32, i32
  }
  func.func @transform_3(%arg0: i32) -> (i32, i32) {
    %c0_i32 = arith.constant 0 : i32
    %c0_i32_0 = arith.constant 0 : i32
    %c0_i32_1 = arith.constant 0 : i32
    return %c0_i32, %c0_i32_0 : i32, i32
  }
  func.func @transform_4(%arg0: i32) -> (i32, i32) {
    %c0_i32 = arith.constant 0 : i32
    %c0_i32_0 = arith.constant 0 : i32
    %c0_i32_1 = arith.constant 0 : i32
    return %c0_i32, %c0_i32_0 : i32, i32
  }
  func.func @transform_5(%arg0: i32) -> (i32, i32) {
    %c0_i32 = arith.constant 0 : i32
    %c0_i32_0 = arith.constant 0 : i32
    return %arg0, %c0_i32 : i32, i32
  }
}

</mosaic_0001>

<bundles_post_ra>
// kernel: tpu_custom_call.1
= control target key start
LH: loop header
LB: loop body
LE: loop exit
PB: predicated region body
PF: predicated region fallthrough
CT: control target
= control target key end

     0   :  { %10 = vsyncpa [#allocation3], 0  ;;  %s562_s0 = inlined_call_operand.hbm [shape: f32[8,16], index: 0, kind: input, shape index: {}]   ;;  %s563_s1 = inlined_call_operand.hbm [shape: f32[16,128], index: 1, kind: input, shape index: {}]   ;;  %s564_s2 = inlined_call_operand.vmem [shape: f32[1,128], index: 2, kind: input, shape index: {}]   ;;  %s565_s3 = inlined_call_operand.hbm [shape: f32[128,128], index: 3, kind: input, shape index: {}]   ;;  %s566_s4 = inlined_call_operand.vmem [shape: f32[1,128], index: 4, kind: input, shape index: {}]   ;;  %s567_s5 = inlined_call_operand.hbm [shape: f32[8,128], index: 5, kind: output, shape index: {}]  }
   0x1   :  { %11 = vsyncpa [#allocation6], 0 }
   0x2   :  { %12 = vsyncpa [#allocation4], 0  ;;  %s463_s18 = smov [#allocation5]   ;;  %s369_s22 = scalar_lea.hbm %s563_s1, 256 }
   0x3   :  { %s28_s19 = sshll.u32 %s463_s18, 4  ;;  %p370_p0 = scmp.ne.s32.totalorder %s563_s1, %s369_s22  ;;  %s29_s19 = int_to_ptr.vmem [resolvable:$true] %s28_s19 }
   0x4   :  { %p373_p1 = scmp.lt.u32.totalorder %s369_s22, %s563_s1 }
   0x6   :  { %p375_p2 = pnand %p373_p1, %p370_p0 }
   0x8   :  { %378 = shalt.err (!%p375_p2)
}
   0x9   :  { %s379_s27 = scalar_lea.vmem %s29_s19, 256  ;;  %p384_p4 = scmp.lt.s32.totalorder %s29_s19, %s29_s19 }
   0xa   :  { %p380_p3 = scmp.ne.s32.totalorder %s29_s19, %s379_s27  ;;  %p385_p5 = scmp.lt.s32.totalorder %s379_s27, %s379_s27 }
   0xc   :  { %p386_p6 = por %p385_p5, %p384_p4 }
   0xe   :  { %p387_p7 = pnand %p386_p6, %p380_p3 }
  0x10   :  { %390 = shalt.err (!%p387_p7)
}
  0x11   :  { %s464_s28 = smov 128   ;;  %s465_s29 = smov 8  }
  0x12   :  { %34 = dma.hbm_to_vmem [thread:$0]  %s563_s1, 256, %s29_s19, [#allocation6], %s464_s28, %s464_s28, %s465_s29  }
  0x13   :  { %s466_s7 = smov [#allocation2]   ;;  %s467_s9 = smov [#allocation7]  }
  0x14   :  { %s19_s8 = sshll.u32 %s466_s7, 4  ;;  %s42_s10 = sshll.u32 %s467_s9, 4  ;;  %s20_s8 = int_to_ptr.vmem [resolvable:$true] %s19_s8  ;;  %s43_s10 = int_to_ptr.vmem [resolvable:$true] %s42_s10 }
  0x15   :  { %s391_s13 = scalar_lea.hbm %s562_s0, 128 }
  0x16   :  { %p392_p8 = scmp.ne.s32.totalorder %s562_s0, %s391_s13  ;;  %p395_p9 = scmp.lt.u32.totalorder %s391_s13, %s562_s0 }
  0x18   :  { %p397_p10 = pnand %p395_p9, %p392_p8 }
  0x1a   :  { %400 = shalt.err (!%p397_p10)
}
  0x1b   :  { %s401_s1 = scalar_lea.vmem %s20_s8, 128  ;;  %p406_p12 = scmp.lt.s32.totalorder %s20_s8, %s20_s8 }
  0x1c   :  { %p402_p11 = scmp.ne.s32.totalorder %s20_s8, %s401_s1  ;;  %p407_p13 = scmp.lt.s32.totalorder %s401_s1, %s401_s1 }
  0x1e   :  { %p408_p0 = por %p407_p13, %p406_p12 }
  0x20   :  { %p409_p1 = pnand %p408_p0, %p402_p11 }
  0x22   :  { %412 = shalt.err (!%p409_p1)
}
  0x23   :  { %22 = dma.hbm_to_vmem [thread:$0]  %s562_s0, 128, %s20_s8, [#allocation3]  }
  0x24   :  { %s413_s22 = scalar_lea.hbm %s565_s3, 2048 }
  0x25   :  { %p414_p2 = scmp.ne.s32.totalorder %s565_s3, %s413_s22  ;;  %p417_p3 = scmp.lt.u32.totalorder %s413_s22, %s565_s3 }
  0x27   :  { %p419_p4 = pnand %p417_p3, %p414_p2 }
  0x29   :  { %422 = shalt.err (!%p419_p4)
}
  0x2a   :  { %s423_s27 = scalar_lea.vmem %s43_s10, 2048  ;;  %p428_p6 = scmp.lt.s32.totalorder %s43_s10, %s43_s10 }
  0x2b   :  { %p424_p5 = scmp.ne.s32.totalorder %s43_s10, %s423_s27  ;;  %p429_p7 = scmp.lt.s32.totalorder %s423_s27, %s423_s27 }
  0x2d   :  { %p430_p8 = por %p429_p7, %p428_p6 }
  0x2f   :  { %p431_p9 = pnand %p430_p8, %p424_p5 }
  0x31   :  { %434 = shalt.err (!%p431_p9)
}
  0x32   :  { %48 = dma.hbm_to_vmem [thread:$0]  %s565_s3, 2048, %s43_s10, [#allocation6], %s464_s28, %s464_s28, %s465_s29  }
  0x33   :  { %457 = dma.done.wait [#allocation3], 128  }
  0x34   :  { %458 = vsyncadd [#allocation3], 4294967168 }
  0x35   :  { %459 = dma.done.wait [#allocation6], 2304  }
  0x36   :  { %460 = vsyncadd [#allocation6], 4294964992  ;;  %v468_v0 = vmov 0.0|0.0   ;;  %vm469_vm0 = vmmov 0   ;;  %v470_v1 = vmov 0.0   ;;  %v61_v2 = vld [vmem:[#allocation5] sm:$0xff] }
  0x37   :  { %329 = vmatprep.subr.bf16.mxu0 %v468_v0  ;;  %291 = vmatprep.mubr.msk.f32.mxu0 %vm469_vm0, %v470_v1  ;;  %v62_v3 = vld [vmem:[#allocation5 + $0x8] sm:$0xff]  ;;  %v145_v5 = vld [vmem:[#allocation7] sm:$0xff]  ;;  %v146_v6 = vld [vmem:[#allocation7 + $0x8] sm:$0xff]  ;;  %vm70_vm1 = vcmask 130048  }
  0x38   :  { %332 = vmatprep.subr.bf16.mxu1 %v468_v0  ;;  %326 = vmatprep.mubr.msk.f32.mxu1 %vm469_vm0, %v470_v1  ;;  %v330_v4 = vpack.c.bf16 %v62_v3, %v61_v2  ;;  %v147_v7 = vld [vmem:[#allocation7 + $0x10] sm:$0xff]  ;;  %v333_v8 = vpack.c.bf16 %v146_v6, %v145_v5  ;;  %v148_v9 = vld [vmem:[#allocation7 + $0x18] sm:$0xff]  ;;  %v60_v10 = vld [vmem:[#allocation2] sm:$0xff] }
  0x39   :  { %v336_v11 = vpack.c.bf16 %v148_v9, %v147_v7  ;;  %v149_v12 = vld [vmem:[#allocation7 + $0x20] sm:$0xff]  ;;  %v150_v13 = vld [vmem:[#allocation7 + $0x28] sm:$0xff]  ;;  %v151_v15 = vld [vmem:[#allocation7 + $0x30] sm:$0xff] }
  0x3a   :  { %331 = vmatpush3.bf16.msra.mxu0 %v330_v4  ;;  %334 = vmatpush3.bf16.msra.mxu1 %v333_v8  ;;  %v339_v14 = vpack.c.bf16 %v150_v13, %v149_v12  ;;  %v152_v16 = vld [vmem:[#allocation7 + $0x38] sm:$0xff]  ;;  %v153_v18 = vld [vmem:[#allocation7 + $0x40] sm:$0xff]  ;;  %v154_v19 = vld [vmem:[#allocation7 + $0x48] sm:$0xff] }
  0x3b   :  { %335 = vmatprep.subr.bf16.mxu1 %v468_v0  ;;  %v342_v17 = vpack.c.bf16 %v152_v16, %v151_v15  ;;  %v345_v20 = vpack.c.bf16 %v154_v19, %v153_v18  ;;  %v155_v21 = vld [vmem:[#allocation7 + $0x50] sm:$0xff]  ;;  %v156_v22 = vld [vmem:[#allocation7 + $0x58] sm:$0xff]  ;;  %v157_v24 = vld [vmem:[#allocation7 + $0x60] sm:$0xff] }
  0x3c   :  { %v348_v23 = vpack.c.bf16 %v156_v22, %v155_v21  ;;  %v158_v25 = vld [vmem:[#allocation7 + $0x68] sm:$0xff]  ;;  %v159_v27 = vld [vmem:[#allocation7 + $0x70] sm:$0xff]  ;;  %v160_v28 = vld [vmem:[#allocation7 + $0x78] sm:$0xff] }
  0x3d   :  { %292 = vmatmul.mubr.msk.f32.vlgmr.msra.gmra.mrb[0].mxu0 %vm70_vm1, %v60_v10  ;;  %v351_v26 = vpack.c.bf16 %v158_v25, %v157_v24  ;;  %v354_v29 = vpack.c.bf16 %v160_v28, %v159_v27  ;;  %v264_v30 = vld [vmem:[%s564_s2] ss:$0 sm:$0xff]  ;;  %s471_s2 = smov [#allocation8]  }
  0x3e   :  { %337 = vmatpush3.bf16.msra.mxu1 %v336_v11  ;;  %v266_v35 = vld [vmem:[%s566_s4] ss:$0 sm:$0xff]  ;;  %s254_s7 = sshll.u32 %s471_s2, 4  ;;  %s255_s7 = int_to_ptr.vmem [resolvable:$true] %s254_s7 }
  0x3f   :  { %338 = vmatprep.subr.bf16.mxu1 %v468_v0  ;;  %s435_s8 = scalar_lea.vmem %s255_s7, 128  ;;  %p440_p11 = scmp.lt.s32.totalorder %s255_s7, %s255_s7 }
  0x40   :  { %p436_p10 = scmp.ne.s32.totalorder %s255_s7, %s435_s8  ;;  %p441_p12 = scmp.lt.s32.totalorder %s435_s8, %s435_s8 }
  0x42   :  { %340 = vmatpush3.bf16.msra.mxu1 %v339_v14  ;;  %p442_p13 = por %p441_p12, %p440_p11 }
  0x43   :  { %341 = vmatprep.subr.bf16.mxu1 %v468_v0 }
  0x44   :  { %p443_p0 = pnand %p442_p13, %p436_p10 }
  0x46   :  { %343 = vmatpush3.bf16.msra.mxu1 %v342_v17 }
  0x47   :  { %344 = vmatprep.subr.bf16.mxu1 %v468_v0 }
  0x4a   :  { %346 = vmatpush3.bf16.msra.mxu1 %v345_v20 }
  0x4b   :  { %347 = vmatprep.subr.bf16.mxu1 %v468_v0 }
  0x4e   :  { %349 = vmatpush3.bf16.msra.mxu1 %v348_v23 }
  0x4f   :  { %350 = vmatprep.subr.bf16.mxu1 %v468_v0 }
  0x52   :  { %352 = vmatpush3.bf16.msra.mxu1 %v351_v26 }
  0x53   :  { %353 = vmatprep.subr.bf16.mxu1 %v468_v0 }
  0x56   :  { %355 = vmatpush3.bf16.msra.mxu1 %v354_v29 }
 0x110   :  { %v140_v31 = vpop.f32.mrb[0].mxu0 }
 0x111   :  { %v141_v32 = vadd.f32 %v264_v30, %v140_v31  ;;  %v293_v33 = vpop.f32.mrb[1].mxu0 }
 0x113   :  { %v144_v34 = vmax.f32 %v141_v32, 0.0 }
 0x115   :  { %327 = vmatmul.mubr.f32.vlgmr.msra.gmra.mrb[0].mxu1 %v144_v34 }
 0x1e8   :  { %v234_v36 = vpop.f32.mrb[0].mxu1 }
 0x1e9   :  { %v235_v37 = vadd.f32 %v266_v35, %v234_v36  ;;  %v328_v38 = vpop.f32.mrb[1].mxu1 }
 0x1eb   :  { %238 = vmax.xlane.f32.xlu0 %v235_v37 }
 0x278   :  { %v239_v39 = vpop.xlane.xlu0 %238 }
 0x279   :  { %v240_v40 = vsub.f32 %v235_v37, %v239_v39 }
 0x27b   :  { %v241_v41 = vmul.f32 1.442695, %v240_v40 }
 0x27d   :  { %365 = vpow2.f32 %v241_v41 }
 0x287   :  { %v366_v42 = vpop.eup %365 }
 0x288   :  { %243 = vadd.xlane.f32.xlu0 %v366_v42 }
 0x315   :  { %v244_v43 = vpop.xlane.xlu0 %243 }
 0x316   :  { %367 = vrcp.f32 %v244_v43 }
 0x320   :  { %v368_v44 = vpop.eup %367 }
 0x321   :  { %v246_v45 = vmul.f32 %v368_v44, %v366_v42 }
 0x323   :  { %247 = vst [vmem:[#allocation8] sm:$0xff] %v246_v45 }
 0x324   :  { %446 = shalt.err (!%p443_p0)
}
 0x325   :  { %s447_s10 = scalar_lea.hbm %s567_s5, 128 }
 0x326   :  { %p448_p1 = scmp.ne.s32.totalorder %s567_s5, %s447_s10  ;;  %p451_p2 = scmp.lt.u32.totalorder %s447_s10, %s567_s5 }
 0x328   :  { %p453_p3 = pnand %p451_p2, %p448_p1 }
 0x32a   :  { %456 = shalt.err (!%p453_p3)
}
 0x32b   :  { %257 = dma.vmem_to_hbm [thread:$0]  %s255_s7, 128, %s567_s5, [#allocation4]  }
 0x32c   :  { %461 = dma.done.wait [#allocation4], 128  }
 0x32d   :  { %462 = vsyncadd [#allocation4], 4294967168 }
 0x32e   :  { %261 = vsyncpa [#allocation3], 1 }
 0x32f   :  { %262 = vsyncpa [#allocation6], 1 }
 0x330   :  { %263 = vsyncpa [#allocation4], 1 }

</bundles_post_ra>
